<compile_context>
chip_gen: v7x
topology: tpu7x:2x2x1
jax: 0.10.0
libtpu: 0.0.40
codegen_flags: <defaults>
</compile_context>

<pallas_src>
import math

import jax
import jax.numpy as jnp
from jax.experimental import pallas as pl
from jax.experimental.pallas import tpu as pltpu


# ----------------------------------------------------------------------------
# Fused kernel: merge (K,N)-layout weight tile + matmul + bias merge + beta
# ----------------------------------------------------------------------------
def _fused_merge_linear_kernel(alpha_ref, beta_ref,
                               x_ref, tvw_ref, wavgw_ref, tvb_ref, wavgb_ref,
                               o_ref, acc_ref):
    # alpha_ref: (J,) SMEM ; beta_ref: (1,) SMEM
    # x_ref: (tm, tk) ; tvw_ref: (J, tk, tn) ; wavgw_ref: (tk, tn)
    # tvb_ref: (J, 1, tn) ; wavgb_ref: (1, tn) ; o_ref: (tm, tn)
    # acc_ref: (tm, tn) f32 VMEM scratch (persists across the K grid axis)
    k = pl.program_id(2)
    nk = pl.num_programs(2)
    num_clusters = tvw_ref.shape[0]

    @pl.when(k == 0)
    def _():
        acc_ref[...] = jnp.zeros_like(acc_ref)

    # Merge the weight tile in f32 (MXU-native (K, N) layout -> no transpose).
    w_tile = wavgw_ref[...].astype(jnp.float32)
    for j in range(num_clusters):                 # static, small J -> unrolled
        w_tile = w_tile + alpha_ref[j] * tvw_ref[j].astype(jnp.float32)

    # Feed the freshly-merged tile straight to the MXU; accumulate in f32.
    acc_ref[...] += jax.lax.dot_general(
        x_ref[...].astype(jnp.float32), w_tile,
        (((1,), (0,)), ((), ())),                 # contract x's K with W's K (no .T)
        preferred_element_type=jnp.float32,
    )

    # Epilogue on the last K step: merge bias, add, scale by beta, store.
    @pl.when(k == nk - 1)
    def _():
        b_tile = wavgb_ref[...].astype(jnp.float32)
        for j in range(num_clusters):
            b_tile = b_tile + alpha_ref[j] * tvb_ref[j].astype(jnp.float32)
        o_ref[...] = (beta_ref[0] * (acc_ref[...] + b_tile)).astype(o_ref.dtype)


def _round_up(x, m):
    return (x + m - 1) // m * m


def _pad_to(arr, target_shape):
    pads = [(0, t - s) for s, t in zip(arr.shape, target_shape)]
    if all(p == (0, 0) for p in pads):
        return arr
    return jnp.pad(arr, pads)


def fused_merge_linear_forward(x, alphas, beta, tv_w, wavg_w, tv_b, wavg_b,
                               *, tn=128, tk=128):
    """out = beta * (x @ (sum_j alphas[j]*tv_w[j] + wavg_w) + merged_bias).

    x: (B, K); tv_w: (J, K, N); wavg_w: (K, N); tv_b: (J, 1, N); wavg_b: (1, N).
    """
    B, K = x.shape
    J, Kw, N = tv_w.shape
    assert Kw == K and wavg_w.shape == (K, N)

    tm = min(_round_up(max(B, 1), 8), 128)
    Bp = _round_up(B, tm)
    Kp = _round_up(K, tk)
    Np = _round_up(N, tn)

    xp = _pad_to(x, (Bp, Kp))
    tvw = _pad_to(tv_w, (J, Kp, Np))
    waw = _pad_to(wavg_w, (Kp, Np))
    tvb = _pad_to(tv_b, (J, 1, Np))
    wab = _pad_to(wavg_b, (1, Np))

    grid = (Bp // tm, Np // tn, Kp // tk)

    out = pl.pallas_call(
        _fused_merge_linear_kernel,
        out_shape=jax.ShapeDtypeStruct((Bp, Np), x.dtype),
        grid_spec=pltpu.PrefetchScalarGridSpec(
            num_scalar_prefetch=0,
            grid=grid,
            in_specs=[
                pl.BlockSpec(memory_space=pltpu.MemorySpace.SMEM),    # alphas (J,)
                pl.BlockSpec(memory_space=pltpu.MemorySpace.SMEM),    # beta   (1,)
                pl.BlockSpec((tm, tk), lambda i, j, k: (i, k)),       # x tile
                pl.BlockSpec((J, tk, tn), lambda i, j, k: (0, k, j)), # tv_w tiles (all J)
                pl.BlockSpec((tk, tn), lambda i, j, k: (k, j)),       # w_avg weight tile
                pl.BlockSpec((J, 1, tn), lambda i, j, k: (0, 0, j)),  # tv_b tiles
                pl.BlockSpec((1, tn), lambda i, j, k: (0, j)),        # w_avg bias tile
            ],
            out_specs=pl.BlockSpec((tm, tn), lambda i, j, k: (i, j)),
            scratch_shapes=[pltpu.VMEM((tm, tn), jnp.float32)],
        ),
        compiler_params=pltpu.CompilerParams(
            dimension_semantics=("parallel", "parallel", "arbitrary"),
            vmem_limit_bytes=32 * 1024 * 1024,
        ),
    )(alphas, beta, xp, tvw, waw, tvb, wab)

    return out[:B, :N]


# ----------------------------------------------------------------------------
# LambdaWrapper (JAX / Pallas version)
# ----------------------------------------------------------------------------
class LambdaWrapperPallas:
    def __init__(self, num_clusters, alpha_init, w_avg, task_vectors):
        # Matches the PyTorch module exactly: when alpha_init is None, raw_alphas is
        # initialized to softmax(ones) (and alphas() applies softmax again, as upstream).
        if alpha_init is None:
            self.raw_alphas = jax.nn.softmax(
                jnp.ones((num_clusters,), jnp.float32), axis=0)
        else:
            self.raw_alphas = jnp.asarray(
                [math.log(a) for a in alpha_init], jnp.float32)
        self.beta = jnp.ones((1,), jnp.float32)

        # w_avg / task_vectors follow the nn.Linear convention: weight (N, K), bias (N,).
        w_avg_weight, w_avg_bias = w_avg
        # MXU-native (K, N) layout; transposed ONCE here, never per forward.
        self.wavg_w = jnp.asarray(w_avg_weight).T                      # (K, N)
        self.wavg_b = jnp.asarray(w_avg_bias).reshape(1, -1)           # (1, N)
        # Persistent pre-stacked task vectors (no per-forward jnp.stack HBM copies).
        self.tv_w = jnp.stack([jnp.asarray(tw).T for tw, _ in task_vectors], axis=0)   # (J, K, N)
        self.tv_b = jnp.stack([jnp.asarray(tb).reshape(1, -1)
                               for _, tb in task_vectors], axis=0)                     # (J, 1, N)

    def alphas(self):
        return jax.nn.softmax(self.raw_alphas, axis=0)

    def __call__(self, x):
        # TODO(synk): the original wraps an arbitrary `arch`; only an nn.Linear head
        # is implemented here, which is what keeps merge+forward inside one kernel.
        return fused_merge_linear_forward(
            x, self.alphas(), self.beta,
            self.tv_w, self.wavg_w, self.tv_b, self.wavg_b)


# ----------------------------------------------------------------------------
# Pure-JAX reference (PyTorch layout: weight (N, K), bias (N,))
# ----------------------------------------------------------------------------
def reference_forward(raw_alphas, beta, w_avg, task_vectors, x):
    alphas = jax.nn.softmax(raw_alphas, axis=0)
    params = tuple(
        sum(p * alphas[j] for j, p in enumerate(tv)) + w_avg[i]
        for i, tv in enumerate(zip(*task_vectors))
    )
    weight, bias = params
    return beta * (x @ weight.T + bias[None, :])


if __name__ == "__main__":
    num_clusters = 4
    batch, in_features, out_features = 8, 256, 256   # 8/128-aligned, lane-dense

    key = jax.random.PRNGKey(0)
    keys = jax.random.split(key, 3 + 2 * num_clusters)

    # Deterministic synthetic "checkpoint": averaged weights + J task vectors,
    # in the PyTorch nn.Linear convention (weight (N, K), bias (N,)).
    w_avg = (
        jax.random.normal(keys[0], (out_features, in_features), jnp.float32) * 0.05,
        jax.random.normal(keys[1], (out_features,), jnp.float32) * 0.05,
    )
    task_vectors = [
        (
            jax.random.normal(keys[3 + 2 * j], (out_features, in_features), jnp.float32) * 0.02,
            jax.random.normal(keys[3 + 2 * j + 1], (out_features,), jnp.float32) * 0.02,
        )
        for j in range(num_clusters)
    ]

    x = jax.random.normal(keys[2], (batch, in_features), jnp.float32)

    model = LambdaWrapperPallas(num_clusters, alpha_init=None,
                                w_avg=w_avg, task_vectors=task_vectors)

    out = model(x)
    out = jax.block_until_ready(out)

    ref = reference_forward(model.raw_alphas, model.beta, w_avg, task_vectors, x)
    assert out.shape == (batch, out_features)
    assert jnp.allclose(out, ref, atol=2e-3, rtol=2e-3), (
        "mismatch vs reference, max abs err = "
        f"{float(jnp.max(jnp.abs(out - ref)))}")

    print("KERNEL_OK")
</pallas_src>

<mosaic_0001>
module attributes {stable_mosaic.version = 11 : i64} {
  func.func @_fused_merge_linear_kernel(%arg0: i32, %arg1: i32, %arg2: i32, %arg3: memref<4xf32, #tpu.memory_space<smem>>, %arg4: memref<1xf32, #tpu.memory_space<smem>>, %arg5: memref<8x128xf32, #tpu.memory_space<vmem>>, %arg6: memref<4x128x128xf32, #tpu.memory_space<vmem>>, %arg7: memref<128x128xf32, #tpu.memory_space<vmem>>, %arg8: memref<4x1x128xf32, #tpu.memory_space<vmem>>, %arg9: memref<1x128xf32, #tpu.memory_space<vmem>>, %arg10: memref<8x128xf32, #tpu.memory_space<vmem>>, %arg11: memref<8x128xf32, #tpu.memory_space<vmem>>) attributes {dimension_semantics = [#tpu.dimension_semantics<parallel>, #tpu.dimension_semantics<parallel>, #tpu.dimension_semantics<arbitrary>], iteration_bounds = array<i64: 1, 2, 2>, scalar_prefetch = 0 : i64, scratch_operands = 1 : i64, tpu.core_type = #tpu.core_type<tc>, window_params = [{transform_indices = @transform_0, window_bounds = array<i64: 4>}, {transform_indices = @transform_1, window_bounds = array<i64: 1>}, {transform_indices = @transform_2, window_bounds = array<i64: 8, 128>}, {transform_indices = @transform_3, window_bounds = array<i64: 4, 128, 128>}, {transform_indices = @transform_4, window_bounds = array<i64: 128, 128>}, {transform_indices = @transform_5, window_bounds = array<i64: 4, 1, 128>}, {transform_indices = @transform_6, window_bounds = array<i64: 1, 128>}, {transform_indices = @transform_7, window_bounds = array<i64: 8, 128>}]} {
    %c0_i32 = arith.constant 0 : i32
    %0 = arith.cmpi eq, %arg2, %c0_i32 : i32
    %1 = arith.extui %0 : i1 to i32
    %c0_i32_0 = arith.constant 0 : i32
    %2 = arith.cmpi ne, %1, %c0_i32_0 : i32
    scf.if %2 {
      %cst_22 = arith.constant 0.000000e+00 : f32
      %36 = vector.broadcast %cst_22 : f32 to vector<8x128xf32>
      %c0_23 = arith.constant 0 : index
      %c0_24 = arith.constant 0 : index
      %37 = vector.load %arg11[%c0_23, %c0_24] : memref<8x128xf32, #tpu.memory_space<vmem>>, vector<8x128xf32>
      tpu.vector_store %arg11[%c0_23, %c0_24], %36 {strides = array<i32>} : memref<8x128xf32, #tpu.memory_space<vmem>>, vector<8x128xf32>,
    } else {
    }
    %c0 = arith.constant 0 : index
    %c0_1 = arith.constant 0 : index
    %3 = vector.load %arg7[%c0, %c0_1] : memref<128x128xf32, #tpu.memory_space<vmem>>, vector<128x128xf32>
    %c0_2 = arith.constant 0 : index
    %4 = memref.load %arg3[%c0_2] : memref<4xf32, #tpu.memory_space<smem>>
    %c0_3 = arith.constant 0 : index
    %c0_4 = arith.constant 0 : index
    %c0_5 = arith.constant 0 : index
    %5 = vector.load %arg6[%c0_3, %c0_4, %c0_5] : memref<4x128x128xf32, #tpu.memory_space<vmem>>, vector<1x128x128xf32>
    %6 = vector.shape_cast %5 : vector<1x128x128xf32> to vector<128x128xf32>
    %7 = vector.broadcast %4 : f32 to vector<128x128xf32>
    %8 = arith.mulf %7, %6 : vector<128x128xf32>
    %9 = arith.addf %3, %8 : vector<128x128xf32>
    %c1 = arith.constant 1 : index
    %10 = memref.load %arg3[%c1] : memref<4xf32, #tpu.memory_space<smem>>
    %c1_6 = arith.constant 1 : index
    %c0_7 = arith.constant 0 : index
    %c0_8 = arith.constant 0 : index
    %11 = vector.load %arg6[%c1_6, %c0_7, %c0_8] : memref<4x128x128xf32, #tpu.memory_space<vmem>>, vector<1x128x128xf32>
    %12 = vector.shape_cast %11 : vector<1x128x128xf32> to vector<128x128xf32>
    %13 = vector.broadcast %10 : f32 to vector<128x128xf32>
    %14 = arith.mulf %13, %12 : vector<128x128xf32>
    %15 = arith.addf %9, %14 : vector<128x128xf32>
    %c2 = arith.constant 2 : index
    %16 = memref.load %arg3[%c2] : memref<4xf32, #tpu.memory_space<smem>>
    %c2_9 = arith.constant 2 : index
    %c0_10 = arith.constant 0 : index
    %c0_11 = arith.constant 0 : index
    %17 = vector.load %arg6[%c2_9, %c0_10, %c0_11] : memref<4x128x128xf32, #tpu.memory_space<vmem>>, vector<1x128x128xf32>
    %18 = vector.shape_cast %17 : vector<1x128x128xf32> to vector<128x128xf32>
    %19 = vector.broadcast %16 : f32 to vector<128x128xf32>
    %20 = arith.mulf %19, %18 : vector<128x128xf32>
    %21 = arith.addf %15, %20 : vector<128x128xf32>
    %c3 = arith.constant 3 : index
    %22 = memref.load %arg3[%c3] : memref<4xf32, #tpu.memory_space<smem>>
    %c3_12 = arith.constant 3 : index
    %c0_13 = arith.constant 0 : index
    %c0_14 = arith.constant 0 : index
    %23 = vector.load %arg6[%c3_12, %c0_13, %c0_14] : memref<4x128x128xf32, #tpu.memory_space<vmem>>, vector<1x128x128xf32>
    %24 = vector.shape_cast %23 : vector<1x128x128xf32> to vector<128x128xf32>
    %25 = vector.broadcast %22 : f32 to vector<128x128xf32>
    %26 = arith.mulf %25, %24 : vector<128x128xf32>
    %27 = arith.addf %21, %26 : vector<128x128xf32>
    %c0_15 = arith.constant 0 : index
    %c0_16 = arith.constant 0 : index
    %28 = vector.load %arg11[%c0_15, %c0_16] : memref<8x128xf32, #tpu.memory_space<vmem>>, vector<8x128xf32>
    %c0_17 = arith.constant 0 : index
    %c0_18 = arith.constant 0 : index
    %29 = vector.load %arg5[%c0_17, %c0_18] : memref<8x128xf32, #tpu.memory_space<vmem>>, vector<8x128xf32>
    %cst = arith.constant dense<0.000000e+00> : vector<8x128xf32>
    %30 = tpu.matmul %29, %27, %cst {dimension_numbers = #tpu.dot_dimension_numbers<[1], [0], [0], [1], [0, 0, 1, 1], [], []>} : vector<8x128xf32>, vector<128x128xf32>, vector<8x128xf32> -> vector<8x128xf32>
    %31 = arith.addf %28, %30 : vector<8x128xf32>
    %c0_19 = arith.constant 0 : index
    %c0_20 = arith.constant 0 : index
    %32 = vector.load %arg11[%c0_19, %c0_20] : memref<8x128xf32, #tpu.memory_space<vmem>>, vector<8x128xf32>
    tpu.vector_store %arg11[%c0_19, %c0_20], %31 {strides = array<i32>} : memref<8x128xf32, #tpu.memory_space<vmem>>, vector<8x128xf32>,
    %c1_i32 = arith.constant 1 : i32
    %33 = arith.cmpi eq, %arg2, %c1_i32 : i32
    %34 = arith.extui %33 : i1 to i32
    %c0_i32_21 = arith.constant 0 : i32
    %35 = arith.cmpi ne, %34, %c0_i32_21 : i32
    scf.if %35 {
      %c0_22 = arith.constant 0 : index
      %c0_23 = arith.constant 0 : index
      %36 = vector.load %arg9[%c0_22, %c0_23] : memref<1x128xf32, #tpu.memory_space<vmem>>, vector<1x128xf32>
      %c0_24 = arith.constant 0 : index
      %37 = memref.load %arg3[%c0_24] : memref<4xf32, #tpu.memory_space<smem>>
      %c0_25 = arith.constant 0 : index
      %c0_26 = arith.constant 0 : index
      %c0_27 = arith.constant 0 : index
      %38 = vector.load %arg8[%c0_25, %c0_26, %c0_27] : memref<4x1x128xf32, #tpu.memory_space<vmem>>, vector<1x1x128xf32>
      %39 = vector.shape_cast %38 : vector<1x1x128xf32> to vector<1x128xf32>
      %40 = vector.broadcast %37 : f32 to vector<1x128xf32>
      %41 = arith.mulf %40, %39 : vector<1x128xf32>
      %42 = arith.addf %36, %41 : vector<1x128xf32>
      %c1_28 = arith.constant 1 : index
      %43 = memref.load %arg3[%c1_28] : memref<4xf32, #tpu.memory_space<smem>>
      %c1_29 = arith.constant 1 : index
      %c0_30 = arith.constant 0 : index
      %c0_31 = arith.constant 0 : index
      %44 = vector.load %arg8[%c1_29, %c0_30, %c0_31] : memref<4x1x128xf32, #tpu.memory_space<vmem>>, vector<1x1x128xf32>
      %45 = vector.shape_cast %44 : vector<1x1x128xf32> to vector<1x128xf32>
      %46 = vector.broadcast %43 : f32 to vector<1x128xf32>
      %47 = arith.mulf %46, %45 : vector<1x128xf32>
      %48 = arith.addf %42, %47 : vector<1x128xf32>
      %c2_32 = arith.constant 2 : index
      %49 = memref.load %arg3[%c2_32] : memref<4xf32, #tpu.memory_space<smem>>
      %c2_33 = arith.constant 2 : index
      %c0_34 = arith.constant 0 : index
      %c0_35 = arith.constant 0 : index
      %50 = vector.load %arg8[%c2_33, %c0_34, %c0_35] : memref<4x1x128xf32, #tpu.memory_space<vmem>>, vector<1x1x128xf32>
      %51 = vector.shape_cast %50 : vector<1x1x128xf32> to vector<1x128xf32>
      %52 = vector.broadcast %49 : f32 to vector<1x128xf32>
      %53 = arith.mulf %52, %51 : vector<1x128xf32>
      %54 = arith.addf %48, %53 : vector<1x128xf32>
      %c3_36 = arith.constant 3 : index
      %55 = memref.load %arg3[%c3_36] : memref<4xf32, #tpu.memory_space<smem>>
      %c3_37 = arith.constant 3 : index
      %c0_38 = arith.constant 0 : index
      %c0_39 = arith.constant 0 : index
      %56 = vector.load %arg8[%c3_37, %c0_38, %c0_39] : memref<4x1x128xf32, #tpu.memory_space<vmem>>, vector<1x1x128xf32>
      %57 = vector.shape_cast %56 : vector<1x1x128xf32> to vector<1x128xf32>
      %58 = vector.broadcast %55 : f32 to vector<1x128xf32>
      %59 = arith.mulf %58, %57 : vector<1x128xf32>
      %60 = arith.addf %54, %59 : vector<1x128xf32>
      %c0_40 = arith.constant 0 : index
      %61 = memref.load %arg4[%c0_40] : memref<1xf32, #tpu.memory_space<smem>>
      %c0_41 = arith.constant 0 : index
      %c0_42 = arith.constant 0 : index
      %62 = vector.load %arg11[%c0_41, %c0_42] : memref<8x128xf32, #tpu.memory_space<vmem>>, vector<8x128xf32>
      %63 = vector.broadcast %60 : vector<1x128xf32> to vector<8x128xf32>
      %64 = arith.addf %62, %63 : vector<8x128xf32>
      %65 = vector.broadcast %61 : f32 to vector<8x128xf32>
      %66 = arith.mulf %65, %64 : vector<8x128xf32>
      %c0_43 = arith.constant 0 : index
      %c0_44 = arith.constant 0 : index
      %67 = vector.load %arg10[%c0_43, %c0_44] : memref<8x128xf32, #tpu.memory_space<vmem>>, vector<8x128xf32>
      tpu.vector_store %arg10[%c0_43, %c0_44], %66 {strides = array<i32>} : memref<8x128xf32, #tpu.memory_space<vmem>>, vector<8x128xf32>,
    } else {
    }
    return
  }
  func.func @transform_0(%arg0: i32, %arg1: i32, %arg2: i32) -> i32 {
    %c0_i32 = arith.constant 0 : i32
    %c0_i32_0 = arith.constant 0 : i32
    return %c0_i32 : i32
  }
  func.func @transform_1(%arg0: i32, %arg1: i32, %arg2: i32) -> i32 {
    %c0_i32 = arith.constant 0 : i32
    %c0_i32_0 = arith.constant 0 : i32
    return %c0_i32 : i32
  }
  func.func @transform_2(%arg0: i32, %arg1: i32, %arg2: i32) -> (i32, i32) {
    %c0_i32 = arith.constant 0 : i32
    return %arg0, %arg2 : i32, i32
  }
  func.func @transform_3(%arg0: i32, %arg1: i32, %arg2: i32) -> (i32, i32, i32) {
    %c0_i32 = arith.constant 0 : i32
    %c0_i32_0 = arith.constant 0 : i32
    return %c0_i32, %arg2, %arg1 : i32, i32, i32
  }
  func.func @transform_4(%arg0: i32, %arg1: i32, %arg2: i32) -> (i32, i32) {
    %c0_i32 = arith.constant 0 : i32
    return %arg2, %arg1 : i32, i32
  }
  func.func @transform_5(%arg0: i32, %arg1: i32, %arg2: i32) -> (i32, i32, i32) {
    %c0_i32 = arith.constant 0 : i32
    %c0_i32_0 = arith.constant 0 : i32
    %c0_i32_1 = arith.constant 0 : i32
    return %c0_i32, %c0_i32_0, %arg1 : i32, i32, i32
  }
  func.func @transform_6(%arg0: i32, %arg1: i32, %arg2: i32) -> (i32, i32) {
    %c0_i32 = arith.constant 0 : i32
    %c0_i32_0 = arith.constant 0 : i32
    return %c0_i32, %arg1 : i32, i32
  }
  func.func @transform_7(%arg0: i32, %arg1: i32, %arg2: i32) -> (i32, i32) {
    %c0_i32 = arith.constant 0 : i32
    return %arg0, %arg1 : i32, i32
  }
}

</mosaic_0001>

<bundles_post_ra>
// kernel: tpu_custom_call.1
= control target key start
LH: loop header
LB: loop body
LE: loop exit
PB: predicated region body
PF: predicated region fallthrough
CT: control target
= control target key end

     0   :  { %s2207_s0 = inlined_call_operand.vmem [shape: f32[4], index: 0, kind: input, shape index: {}]   ;;  %s2208_s1 = inlined_call_operand.<no memory space> [shape: f32[1], index: 1, kind: input, shape index: {}]   ;;  %s2209_s2 = inlined_call_operand.hbm [shape: f32[8,256], index: 2, kind: input, shape index: {}]   ;;  %s2210_s3 = inlined_call_operand.hbm [shape: f32[4,256,256], index: 3, kind: input, shape index: {}]   ;;  %s2211_s4 = inlined_call_operand.hbm [shape: f32[256,256], index: 4, kind: input, shape index: {}]   ;;  %s2212_s5 = inlined_call_operand.vmem [shape: f32[4,1,256], index: 5, kind: input, shape index: {}]   ;;  %s2213_s6 = inlined_call_operand.vmem [shape: f32[1,256], index: 6, kind: input, shape index: {}]   ;;  %s2214_s7 = inlined_call_operand.hbm [shape: f32[8,256], index: 7, kind: output, shape index: {}]  }
   0x1   :  { %2232 = sst [smem:[#allocation33_spill]] %s2207_s0 }
   0x2   :  { %2233 = sst [smem:[#allocation34_spill]] %s2209_s2 }
   0x3   :  { %2234 = sst [smem:[#allocation35_spill]] %s2210_s3 }
   0x4   :  { %2235 = sst [smem:[#allocation36_spill]] %s2213_s6 }
   0x5   :  { %2236 = sst [smem:[#allocation37_spill]] %s2214_s7 }
   0x6   :  { %12 = sst [smem:[#allocation3]] %s2208_s1 }
   0x7   :  { %13 = vsyncpa [#allocation7], 0 }
   0x8   :  { %14 = vsyncpa [#allocation5], 0 }
   0x9   :  { %16 = vsyncpa [#allocation5 + $0x1], 0 }
   0xa   :  { %17 = vsyncpa [#allocation10], 0 }
   0xb   :  { %19 = vsyncpa [#allocation10 + $0x1], 0 }
   0xc   :  { %20 = vsyncpa [#allocation6], 0 }
   0xd   :  { %22 = vsyncpa [#allocation6 + $0x1], 0  ;;  %s1662_s26 = smov 0   ;;  %s1664_s27 = smov 0  }
   0xe   :  { %s1666_s28 = smov 0   ;;  %s1668_s29 = smov 0  }
   0xf   :  { %s1670_s30 = smov 0   ;;  %s1672_s8 = smov 0  }
  0x10   :  { %s1674_s1 = smov 0   ;;  %s1676_s9 = smov 0  }
  0x11   :  { %s1678_s10 = smov 0   ;;  %s1680_s11 = smov 0  }
  0x12   :  { %s1682_s12 = smov 0   ;;  %s1684_s13 = smov 0  }
  0x13   :  { %s1686_s14 = smov 0   ;;  %s1688_s15 = smov 0  }
  0x14 LB: > { %2237 = sst [smem:[#allocation21_spill]] %s1547_s26  ;;  %s1731_s16 = sadd.s32 4294967295, %s1599_s15   ;;  %s1599_s15 = sphi %s1688_s15, %s28_s15   ;;  %s1595_s14 = sphi %s1686_s14, %s2302_s14   ;;  %s1591_s13 = sphi %s1684_s13, %s2301_s13   ;;  %s1587_s12 = sphi %s1682_s12, %s2300_s12   ;;  %s1583_s11 = sphi %s1680_s11, %s2299_s11   ;;  %s1579_s10 = sphi %s1678_s10, %s2289_s10   ;;  %s1575_s9 = sphi %s1676_s9, %s2298_s9   ;;  %s1571_s1 = sphi %s1674_s1, %s2297_s1   ;;  %s1567_s8 = sphi %s1672_s8, %s2296_s8   ;;  %s1563_s30 = sphi %s1670_s30, %s2295_s30   ;;  %s1559_s29 = sphi %s1668_s29, %s2294_s29   ;;  %s1555_s28 = sphi %s1666_s28, %s2293_s28   ;;  %s1551_s27 = sphi %s1664_s27, %s2292_s27   ;;  %s1547_s26 = sphi %s1662_s26, %s2285_s26  }
  0x15   : > { %2238 = sst [smem:[#allocation22_spill]] %s1551_s27  ;;  %s40_s18 = sadd.s32 1, %s1591_s13 }
  0x16   : > { %2239 = sst [smem:[#allocation23_spill]] %s1579_s10  ;;  %s43_s19 = sadd.s32 1, %s1595_s14 }
  0x17   : > { %2240 = sst [smem:[#allocation24_spill]] %s1583_s11  ;;  %p41_p0 = scmp.ge.s32.totalorder %s40_s18, 2 }
  0x18   : > { %2241 = sst [smem:[#allocation25_spill]] %s1587_s12  ;;  %s98_s20 = sadd.s32 1, %s1579_s10 }
  0x19   : > { %p105_p1 = scmp.ne.s32.totalorder %s1579_s10, %s1575_s9  ;;  %p106_p2 = scmp.eq.s32.totalorder %s1599_s15, 0 }
  0x1a   : > { %s2304_s18 = smov (%p41_p0, %s40_s18), 0  ;;  %s2306_s19 = smov (!%p41_p0, %s43_s19), %s1595_s14 }
  0x1b   : > { %2242 = sst [smem:[#allocation26_spill]] %s2304_s18  ;;  %s94_s21 = ssub.s32 %s1591_s13, %s2304_s18 }
  0x1c   : > { %p1747_p3 = por %p106_p2, %p105_p1  ;;  %p45_p4 = scmp.ge.s32.totalorder %s2306_s19, 2 }
  0x1d   : > { %p96_p5 = scmp.eq.s32.totalorder %s94_s21, 0  ;;  %p111_p6 = scmp.ne.s32.totalorder %s1575_s9, %s1571_s1 }
  0x1e   : > { %p2216_p7 = scmp.eq.s32.totalorder %s1731_s16, 0  ;;  %s2308_s19 = smov (%p45_p4, %s2306_s19), 0 }
  0x1f   : > { %2244 = sst [smem:[#allocation27_spill]] %s2308_s19  ;;  %s122_s25 = ssub.s32 %s1595_s14, %s2308_s19 }
  0x20   : > { %s1756_s23 = scalar_select %p96_p5, %s1579_s10, %s98_s20  }
  0x21   : > { %p1760_p8 = por %p2216_p7, %p111_p6  ;;  %s123_s1 = sor.u32 %s122_s25, %s94_s21 }
  0x22   : > { %2245 = sst [smem:[#allocation28_spill]] %s1756_s23  ;;  %s126_s17 = sadd.s32 1, %s1567_s8 }
  0x23   : > { %s2246_s24 = scalar_select %p1760_p8, 1, 0 }
  0x24   : > { %p124_p9 = scmp.eq.s32.totalorder %s123_s1, 0  ;;  %p133_p10 = scmp.ne.s32.totalorder %s1567_s8, %s1563_s30 }
  0x25   : > { %p139_p11 = scmp.ne.s32.totalorder %s1563_s30, %s1559_s29  ;;  %p178_p12 = scmp.eq.s32.totalorder %s122_s25, 0 }
  0x26   : > { %s1772_s20 = scalar_select %p124_p9, %s1567_s8, %s126_s17  }
  0x27   : > { %p1776_p13 = por %p133_p10, %p106_p2  ;;  %p1782_p0 = por %p139_p11, %p2216_p7 }
  0x28   : > { %2247 = sst [smem:[#allocation29_spill]] %s1772_s20  ;;  %s180_s21 = sadd.s32 1, %s1555_s28 }
  0x29   : > { %s2248_s18 = scalar_select %p1776_p13, 1, 0 }
  0x2a   : > { %s2249_s23 = scalar_select %p1782_p0, 1, 0 }
  0x2b   : > { %p187_p1 = scmp.ne.s32.totalorder %s1555_s28, %s1551_s27  ;;  %p245_p5 = scmp.eq.s32.totalorder %s1731_s16, 3 }
  0x2c   : > { %s1790_s1 = scalar_select %p178_p12, %s1555_s28, %s180_s21  }
  0x2d   : > { %p1794_p4 = por %p187_p1, %p106_p2  ;;  %p250_p6 = scmp.ne.s32.totalorder %s1551_s27, %s1547_s26 }
  0x2e   : > { %2250 = sst [smem:[#allocation30_spill]] %s1790_s1  ;;  %s2252_s17 = sadd.s32 4294967294, %s1599_s15  }
  0x2f   : > { %s2251_s29 = scalar_select %p1794_p4, 1, 0 }
  0x30   : > { %p251_p9 = scmp.eq.s32.totalorder %s2252_s17, 3  ;;  %p1803_p10 = por %p245_p5, %p187_p1 }
  0x31   : > { %p1053_p11 = scmp.ge.s32.totalorder %s1599_s15, 1  ;;  %p258_p12 = scmp.lt.s32.totalorder %s1599_s15, 5 }
  0x32   : > { %s2253_s25 = scalar_select %p1803_p10, 1, 0 }
  0x33   : > { %p1808_p7 = por %p251_p9, %p250_p6  ;;  %p1813_p0 = pnand %p1053_p11, %p258_p12 }
  0x34   : > { %2254 = sst [smem:[#allocation31_spill]] %s2253_s25  ;;  %s2258_s0 = sld [smem:[#allocation33_spill]] }
  0x35   : > { %s2255_s19 = scalar_select %p1808_p7, 1, 0 }
  0x36   : > { %s2257_s21 = scalar_select %p1813_p0, 1, 0 }
  0x37   : > { %2256 = sst [smem:[#allocation32_spill]] %s2255_s19  ;;  %p1236_p2 = pneg %p1813_p0 }
  0x38   : > { %p2259_p1 = scmp.eq.s32.totalorder %s1731_s16, 0 }
  0x3a   : > { %s271_s26 = sshll.u32 %s2258_s0, 4  ;;  %p1237_p5 = pnand %p1236_p2, %p2259_p1  ;;  %s272_s26 = int_to_ptr.vmem [resolvable:$true] %s271_s26 }
  0x3b   : > { %s1374_s17 = scalar_lea.vmem %s272_s26, 16  ;;  %p1382_p8 = scmp.lt.s32.totalorder %s272_s26, %s272_s26 }
  0x3c   : > { %p1375_p6 = scmp.ne.s32.totalorder %s272_s26, %s1374_s17  ;;  %p1376_p9 = pneg %p1237_p5 }
  0x3d   : > { %p1383_p11 = scmp.lt.s32.totalorder %s1374_s17, %s1374_s17 }
  0x3e   : > { %p1377_p10 = pnand %p1376_p9, %p1375_p6 }
  0x3f   : > { %p1384_p12 = por %p1383_p11, %p1382_p8 }
  0x40   : > { %p1378_p7 = pneg %p1377_p10 }
  0x42   : > { %p1385_p4 = pnand %p1384_p12, %p1378_p7 }
  0x44   : > { %1388 = shalt.err (!%p1385_p4)
}
  0x45   : > { %s1601_s19 = smov [#allocation4]   ;;  %p1055_p13 = scmp.ge.s32.totalorder %s1599_s15, 4 }
  0x46   : > { %1239 = dma.vmem_to_smem (!%p1237_p5), %s272_s26, 16, %s1601_s19, [#allocation7]  }
  0x47   : > { %281 = sbr.rel (%p1055_p13) target bundleno = 150 (0x96), region = 24  ;;  %s285_s20 = sand.u32 (!%p1055_p13), 1, %s1579_s10  }
  0x48   : > { %s1057_s1 = sshll.u32 (!%p1055_p13), %s1591_s13, 7  ;;  %s1056_s0 = sshll.u32 (!%p1055_p13), %s285_s20, 3 }
  0x49   : > { %s2260_s2 = sld [smem:[#allocation34_spill]] (!%p1055_p13)  ;;  %s289_s17 = scalar_lea.vmem (!%p1055_p13), [#allocation8], %s1056_s0 }
  0x4a   : > { %s298_s26 = sshll.u32 (!%p1055_p13), %s289_s17, 4  ;;  %s286_s19 = scalar_lea.sflag (!%p1055_p13), [#allocation5], %s285_s20  ;;  %s299_s26 = int_to_ptr.vmem [resolvable:$true] %s298_s26 }
  0x4f   : > { %s1830_s11 = scalar_lea.hbm %s2260_s2, %s1057_s1  ;;  %s1393_s27 = scalar_lea.hbm %s2260_s2, 256 }
  0x50   : > { %s1389_s6 = scalar_lea.hbm %s1830_s11, 128  ;;  %p1394_p4 = scmp.lt.u32.totalorder %s1830_s11, %s2260_s2 }
  0x51   : > { %p1390_p7 = scmp.ne.s32.totalorder %s1830_s11, %s1389_s6  ;;  %p1395_p10 = scmp.lt.u32.totalorder %s1393_s27, %s1389_s6 }
  0x52   : > { %p1397_p1 = scmp.lt.u32.totalorder %s1389_s6, %s1830_s11 }
  0x53   : > { %p1391_p8 = pnand %p1390_p7, %p1747_p3  ;;  %p1396_p2 = por %p1395_p10, %p1394_p4 }
  0x55   : > { %p1392_p13 = pneg %p1391_p8  ;;  %p1398_p5 = por %p1397_p1, %p1396_p2 }
  0x57   : > { %p1399_p6 = pnand %p1398_p5, %p1392_p13 }
  0x59   : > { %1402 = shalt.err (!%p1399_p6)
}
  0x5a   : > { %s1403_s0 = scalar_lea.vmem %s299_s26, 128  ;;  %s1602_s20 = smov [#allocation8]  }
  0x5b   : > { %p1404_p9 = scmp.ne.s32.totalorder %s299_s26, %s1403_s0  ;;  %s1407_s1 = sshll.u32 %s1602_s20, 4  ;;  %s1408_s1 = int_to_ptr.vmem [resolvable:$false] %s1407_s1 }
  0x5c   : > { %s1409_s10 = scalar_lea.vmem %s1408_s1, 256  ;;  %p1410_p7 = scmp.lt.s32.totalorder %s299_s26, %s1408_s1 }
  0x5d   : > { %p1405_p11 = pnand %p1404_p9, %p1747_p3  ;;  %p1411_p8 = scmp.lt.s32.totalorder %s1409_s10, %s1403_s0 }
  0x5f   : > { %p1406_p12 = pneg %p1405_p11  ;;  %p1412_p0 = por %p1411_p8, %p1410_p7 }
  0x61   : > { %p1413_p4 = pnand %p1412_p0, %p1406_p12 }
  0x63   : > { %1416 = shalt.err (!%p1413_p4)
}
  0x64   : > { %1219 = dma.hbm_to_vmem [thread:$0]  (%p1747_p3), %s1830_s11, 128, %s299_s26, %s286_s19  }
  0x65   : > { %s2231_s6 = sand.u32 1, %s1567_s8   ;;  %s305_s27 = sand.u32 1, %s1599_s15  }
  0x66   : > { %s1058_s12 = sshll.u32 %s2231_s6, 9  ;;  %s1139_s17 = sshll.u32 %s1591_s13, 5 }
  0x67   : > { %s315_s7 = sadd.s32 %s1595_s14, %s1139_s17  ;;  %s309_s25 = scalar_lea.vmem [#allocation9], %s1058_s12 }
  0x68   : > { %s330_s22 = sshll.u32 %s309_s25, 4  ;;  %s1061_s11 = sshll.u32 %s315_s7, 7  ;;  %s331_s22 = int_to_ptr.vmem [resolvable:$true] %s330_s22 }
  0x69   : > { %p2261_p3 = scmp.ne.s32.totalorder %s2248_s18, 0  ;;  %s1603_s19 = smov 8192  }
  0x6a   : > { %s1604_s20 = smov 2048   ;;  %s1605_s1 = smov 16  }
  0x6b   : > { %s1220_s26 = scalar_select %p2261_p3, [#allocation0], [#allocation16] }
  0x6c   : > { %1221 = sst [smem:[#allocation15]] (%p2261_p3), %s1603_s19  ;;  %s1606_s10 = smov 256  }
  0x6d   : > { %s322_s0 = sld [smem:[%s1220_s26]]   ;;  %s1607_s25 = smov 128  }
  0x6e   : > { %1222 = sst [smem:[#allocation15 + $0x1]] (%p2261_p3), %s1604_s20  ;;  %s2262_s3 = sld [smem:[#allocation35_spill]] }
  0x6f   : > { %1223 = sst [smem:[#allocation15 + $0x2]] (%p2261_p3), %s1605_s1  ;;  %s1608_s6 = smov 8  }
  0x70   : > { %1224 = sst [smem:[#allocation15 + $0x3]] (%p2261_p3), %s1606_s10  ;;  %s1872_s2 = scalar_lea.sflag [#allocation10], %s305_s27 }
  0x71   : > { %1225 = sst [smem:[#allocation15 + $0x4]] (%p2261_p3), %s1607_s25  ;;  %s1609_s20 = smov [#allocation14]  }
  0x72   : > { %1226 = sst [smem:[#allocation15 + $0x5]] (%p2261_p3), %s1608_s6  ;;  %s2263_s1 = sand.u32 1, %s1567_s8  }
  0x73   : > { %s1062_s26 = sshll.u32 %s322_s0, 26  ;;  %s1064_s10 = sshll.u32 %s2263_s1, 7 }
  0x74   : > { %s317_s7 = scalar_lea.hbm %s2262_s3, %s1061_s11  ;;  %s1063_s19 = sadd.s32 134217728, %s1062_s26 }
  0x75   : > { %1227 = dma.general (%p2261_p3), %s317_s7, 8192, %s331_s22, %s1872_s2, %s1609_s20, [#allocation15], %s1063_s19, 0  }
  0x76   : > { %s1882_s3 = scalar_lea.hbm %s2211_s4, %s1061_s11  ;;  %s357_s6 = scalar_lea.vmem [#allocation11], %s1064_s10 }
  0x77   : > { %s366_s27 = sshll.u32 %s357_s6, 4  ;;  %s1417_s0 = scalar_lea.hbm %s1882_s3, 2048  ;;  %s1884_s27 = int_to_ptr.vmem [resolvable:$true] %s366_s27 }
  0x78   : > { %p1418_p0 = scmp.ne.s32.totalorder %s1882_s3, %s1417_s0  ;;  %s1421_s25 = scalar_lea.hbm %s2211_s4, 8192 }
  0x79   : > { %p1422_p2 = scmp.lt.u32.totalorder %s1882_s3, %s2211_s4  ;;  %p1423_p1 = scmp.lt.u32.totalorder %s1421_s25, %s1417_s0 }
  0x7a   : > { %p1419_p13 = pnand %p1418_p0, %p2261_p3  ;;  %p1425_p6 = scmp.lt.u32.totalorder %s1417_s0, %s1882_s3 }
  0x7b   : > { %p1424_p5 = por %p1423_p1, %p1422_p2 }
  0x7c   : > { %p1420_p10 = pneg %p1419_p13 }
  0x7d   : > { %p1426_p9 = por %p1425_p6, %p1424_p5 }
  0x7f   : > { %p1427_p11 = pnand %p1426_p9, %p1420_p10 }
  0x81   : > { %1430 = shalt.err (!%p1427_p11)
}
  0x82   : > { %s1431_s19 = scalar_lea.vmem %s1884_s27, 2048  ;;  %s1610_s20 = smov [#allocation11]  }
  0x83   : > { %p1432_p12 = scmp.ne.s32.totalorder %s1884_s27, %s1431_s19  ;;  %s1435_s1 = sshll.u32 %s1610_s20, 4  ;;  %s1436_s1 = int_to_ptr.vmem [resolvable:$false] %s1435_s1 }
  0x84   : > { %s1437_s10 = scalar_lea.vmem %s1436_s1, 4096  ;;  %p1438_p4 = scmp.lt.s32.totalorder %s1884_s27, %s1436_s1 }
  0x85   : > { %p1433_p7 = pnand %p1432_p12, %p2261_p3  ;;  %p1439_p0 = scmp.lt.s32.totalorder %s1437_s10, %s1431_s19 }
  0x87   : > { %p1434_p8 = pneg %p1433_p7  ;;  %p1440_p13 = por %p1439_p0, %p1438_p4 }
  0x89   : > { %p1441_p2 = pnand %p1440_p13, %p1434_p8 }
  0x8b   : > { %1444 = shalt.err (!%p1441_p2)
}
  0x8c   : > { %s1611_s12 = smov 256   ;;  %s1612_s17 = smov 128  }
  0x8d   : > { %s1613_s6 = smov 8   ;;  %p2264_p10 = scmp.ne.s32.totalorder %s2251_s29, 0 }
  0x8e   : > { %1228 = dma.hbm_to_vmem [thread:$0]  (%p2261_p3), %s1882_s3, 2048, %s1884_s27, %s1872_s2, %s1611_s12, %s1612_s17, %s1613_s6  }
  0x8f   : > { %375 = sbr.rel (!%p2264_p10) target bundleno = 150 (0x96), region = 40  ;;  %s377_s0 = sand.u32 (%p2264_p10), 1, %s1555_s28  }
  0x90   : > { %s380_s25 = scalar_lea.vmem (%p2264_p10), %s2212_s5, %s1595_s14  ;;  %s1068_s26 = sshll.u32 (%p2264_p10), %s377_s0, 2 }
  0x91   : > { %v396_v0 = vld [vmem:[%s380_s25] sm:$0x1] (%p2264_p10)  ;;  %v398_v1 = vld [vmem:[%s380_s25 + $0x2] sm:$0x1] (%p2264_p10)  ;;  %v400_v2 = vld [vmem:[%s380_s25 + $0x4] sm:$0x1] (%p2264_p10) }
  0x92   : > { %v402_v3 = vld [vmem:[%s380_s25 + $0x6] sm:$0x1] (%p2264_p10)  ;;  %s379_s11 = scalar_lea.vmem (%p2264_p10), [#allocation12], %s1068_s26 }
  0x93   : > { %397 = vst [vmem:[%s379_s11] sm:$0x1] (%p2264_p10), %v396_v0  ;;  %399 = vst [vmem:[%s379_s11 + $0x1] sm:$0x1] (%p2264_p10), %v398_v1 }
  0x94   : > { %401 = vst [vmem:[%s379_s11 + $0x2] sm:$0x1] (%p2264_p10), %v400_v2  ;;  %403 = vst [vmem:[%s379_s11 + $0x3] sm:$0x1] (%p2264_p10), %v402_v3 }
  0x96 PF: > { %p2265_p3 = scmp.ne.s32.totalorder %s2257_s21, 0 }
  0x97   : > { %p2266_p1 = scmp.eq.s32.totalorder (!%p2265_p3), %s1731_s16, 0 }
  0x98   : > { %435 = sbr.rel (%p2265_p3) target bundleno = 501 (0x1f5), region = 78 }
  0x9f   : > { %1530 = dma.done.wait (%p2266_p1), [#allocation7], 16   ;;  %p2267_p5 = pmov %p2266_p1 }
  0xa0   : > { %s441_s2 = sand.u32 1, %s1575_s9   ;;  %p2268_p6 = scmp.ne.s32.totalorder %s2246_s24, 0 }
  0xa1   : > { %1532 = vsyncadd (%p2267_p5), [#allocation7], 4294967280  ;;  %s1922_s3 = sshll.u32 %s441_s2, 3  ;;  %s442_s18 = scalar_lea.sflag [#allocation5], %s441_s2 }
  0xa2   : > { %s445_s29 = scalar_lea.vmem [#allocation8], %s1922_s3 }
  0xa3   : > { %1534 = dma.done.wait (%p2268_p6), %s442_s18, 128  }
  0xa4   : > { %1536 = vsyncadd (%p2268_p6), %s442_s18, 4294967168  ;;  %s450_s21 = sand.u32 1, %s1731_s16   ;;  %s452_s27 = sand.u32 1, %s1563_s30  }
  0xa5   : > { %s1072_s19 = sshll.u32 %s452_s27, 9  ;;  %s451_s20 = scalar_lea.sflag [#allocation10], %s450_s21 }
  0xa6   : > { %s1931_s1 = scalar_lea.vmem [#allocation9], %s1072_s19  ;;  %p2269_p9 = scmp.ne.s32.totalorder %s2249_s23, 0 }
  0xa8   : > { %1538 = dma.done.wait (%p2269_p9), %s451_s20, 10240  }
  0xa9   : > { %1540 = vsyncadd (%p2269_p9), %s451_s20, 4294957056  ;;  %s2270_s10 = sld [smem:[#allocation22_spill]]  ;;  %s1073_s12 = sshll.u32 %s452_s27, 7 }
  0xaa   : > { %s1941_s6 = scalar_lea.vmem [#allocation11], %s1073_s12 }
  0xaf   : > { %s1938_s17 = sand.u32 1, %s2270_s10  }
  0xb0   : > { %s1074_s24 = sshll.u32 %s1938_s17, 2 }
  0xb1   : > { %s1943_s0 = scalar_lea.vmem [#allocation12], %s1074_s24 }
  0xb2   : > { %475 = sfence }
  0xb3   : > { %s2271_s16 = sld [smem:[#allocation25_spill]]  ;;  %s1075_s22 = sshll.u32 %s1938_s17, 3 }
  0xb4   : > { %s2272_s25 = sld [smem:[#allocation36_spill]]  ;;  %s1954_s11 = scalar_lea.vmem [#allocation13], %s1075_s22 }
  0xb5   : > { %s2273_s2 = sld [smem:[#allocation24_spill]] }
  0xb9   : > { %p521_p11 = scmp.lt.s32.totalorder %s2271_s16, 1 }
  0xbb   : > { %s2310_s16 = smov (!%p521_p11, %s2271_s16), 1  ;;  %p1076_p12 = scmp.ne.s32.totalorder %s2273_s2, 0 }
  0xbc   : > { %s523_s26 = scalar_lea.vmem %s2272_s25, %s2310_s16  ;;  %v1614_v4 = vmov (!%p1076_p12), 0.0  }
  0xbd   : > { %527 = sbr.rel (%p1076_p12) target bundleno = 196 (0xc4), region = 102  ;;  %528 = vst [vmem:[#allocation2] sm:$0xff] (!%p1076_p12), %v1614_v4 }
  0xc4 PF: > { %s545_s18 = sld [smem:[#allocation4]]  ;;  %v1615_v5 = vmov 0.0|0.0   ;;  %s1077_s21 = sld [smem:[#allocation4 + $0x1]]  ;;  %v529_v6 = vld [vmem:[%s1941_s6] sm:$0xff]  ;;  %v530_v7 = vld [vmem:[%s1941_s6 + $0x8] sm:$0xff]  ;;  %v548_v10 = vld [vmem:[%s1931_s1 + $0x10] sm:$0xff] }
  0xc5   : > { %1193 = vmatprep.subr.bf16.mxu0 %v1615_v5  ;;  %s1094_s27 = sld [smem:[#allocation4 + $0x2]]  ;;  %s1111_s19 = sld [smem:[#allocation4 + $0x3]]  ;;  %v546_v8 = vld [vmem:[%s1931_s1] sm:$0xff]  ;;  %v547_v9 = vld [vmem:[%s1931_s1 + $0x8] sm:$0xff]  ;;  %vm1616_vm0 = vmmov 0   ;;  %v1617_v11 = vmov 0.0  }
  0xc6   : > { %1190 = vmatprep.mubr.msk.f32.mxu0 %vm1616_vm0, %v1617_v11  ;;  %v1078_v12 = vld [vmem:[%s1931_s1 + $0x80] sm:$0xff]  ;;  %v1079_v13 = vld [vmem:[%s1931_s1 + $0x88] sm:$0xff]  ;;  %v531_v22 = vld [vmem:[%s1941_s6 + $0x10] sm:$0xff]  ;;  %s2274_s20 = sld [smem:[#allocation24_spill]] }
  0xc7   : > { %v1095_v14 = vld [vmem:[%s1931_s1 + $0x100] sm:$0xff]  ;;  %v1096_v16 = vld [vmem:[%s1931_s1 + $0x108] sm:$0xff]  ;;  %v532_v23 = vld [vmem:[%s1941_s6 + $0x18] sm:$0xff] }
  0xc8   : > { %v1112_v17 = vld [vmem:[%s1931_s1 + $0x180] sm:$0xff]  ;;  %v1113_v18 = vld [vmem:[%s1931_s1 + $0x188] sm:$0xff]  ;;  %v549_v24 = vld [vmem:[%s1931_s1 + $0x18] sm:$0xff] }
  0xc9   : > { %v1080_v30 = vld [vmem:[%s1931_s1 + $0x90] sm:$0xff]  ;;  %v1081_v31 = vld [vmem:[%s1931_s1 + $0x98] sm:$0xff]  ;;  %v550_v48 = vld [vmem:[%s1931_s1 + $0x20] sm:$0xff] }
  0xca   : > { %v1966_v15 = vstv %s545_s18  ;;  %v1973_v21 = vstv %s1077_s21  ;;  %v1097_v36 = vld [vmem:[%s1931_s1 + $0x110] sm:$0xff]  ;;  %v1098_v37 = vld [vmem:[%s1931_s1 + $0x118] sm:$0xff] }
  0xcb   : > { %v563_v19 = vmul.f32 %v1966_v15, %v546_v8  ;;  %v564_v20 = vmul.f32 %v1966_v15, %v547_v9  ;;  %v565_v25 = vmul.f32 %v1966_v15, %v548_v10  ;;  %v614_v26 = vmul.f32 %v1078_v12, %v1973_v21  ;;  %v1114_v38 = vld [vmem:[%s1931_s1 + $0x190] sm:$0xff]  ;;  %v1115_v43 = vld [vmem:[%s1931_s1 + $0x198] sm:$0xff]  ;;  %v551_v49 = vld [vmem:[%s1931_s1 + $0x28] sm:$0xff] }
  0xcc   : > { %v615_v27 = vmul.f32 %v1079_v13, %v1973_v21  ;;  %v1981_v28 = vstv %s1094_s27  ;;  %v1983_v29 = vstv %s1111_s19  ;;  %v566_v41 = vmul.f32 %v1966_v15, %v549_v24  ;;  %v1082_v50 = vld [vmem:[%s1931_s1 + $0xa0] sm:$0xff]  ;;  %v1083_v55 = vld [vmem:[%s1931_s1 + $0xa8] sm:$0xff]  ;;  %p1128_p7 = scmp.ne.s32.totalorder %s2274_s20, 1 }
  0xcd   : > { %v579_v32 = vadd.f32 %v563_v19, %v529_v6  ;;  %v580_v33 = vadd.f32 %v564_v20, %v530_v7  ;;  %v665_v34 = vmul.f32 %v1095_v14, %v1981_v28  ;;  %v666_v35 = vmul.f32 %v1096_v16, %v1981_v28  ;;  %v533_v60 = vld [vmem:[%s1941_s6 + $0x20] sm:$0xff]  ;;  %v534_v61 = vld [vmem:[%s1941_s6 + $0x28] sm:$0xff]  ;;  %v552_v11 = vld [vmem:[%s1931_s1 + $0x30] sm:$0xff]  ;;  %s1129_s10 = sld [smem:[#allocation4 + $0x1]] (!%p1128_p7)  ;;  %s1131_s12 = sld [smem:[#allocation4 + $0x2]] (!%p1128_p7) }
  0xce   : > { %v716_v39 = vmul.f32 %v1112_v17, %v1983_v29  ;;  %v717_v40 = vmul.f32 %v1113_v18, %v1983_v29  ;;  %v581_v42 = vadd.f32 %v565_v25, %v531_v22  ;;  %v616_v46 = vmul.f32 %v1080_v30, %v1973_v21  ;;  %v1099_v62 = vld [vmem:[%s1931_s1 + $0x120] sm:$0xff]  ;;  %v1100_v3 = vld [vmem:[%s1931_s1 + $0x128] sm:$0xff]  ;;  %v553_v17 = vld [vmem:[%s1931_s1 + $0x38] sm:$0xff]  ;;  %s1133_s24 = sld [smem:[#allocation4 + $0x3]] (!%p1128_p7) }
  0xcf   : > { %v630_v44 = vadd.f32 %v614_v26, %v579_v32  ;;  %v631_v45 = vadd.f32 %v615_v27, %v580_v33  ;;  %v617_v47 = vmul.f32 %v1081_v31, %v1973_v21  ;;  %v582_v51 = vadd.f32 %v566_v41, %v532_v23  ;;  %v1116_v4 = vld [vmem:[%s1931_s1 + $0x1a0] sm:$0xff]  ;;  %v1117_v10 = vld [vmem:[%s1931_s1 + $0x1a8] sm:$0xff]  ;;  %v1084_v18 = vld [vmem:[%s1931_s1 + $0xb0] sm:$0xff]  ;;  %s850_s22 = sld [smem:[#allocation3]] (!%p1128_p7) }
  0xd0   : > { %v667_v52 = vmul.f32 %v1097_v36, %v1981_v28  ;;  %v668_v53 = vmul.f32 %v1098_v37, %v1981_v28  ;;  %v718_v54 = vmul.f32 %v1114_v38, %v1983_v29  ;;  %v632_v58 = vadd.f32 %v616_v46, %v581_v42  ;;  %v1085_v19 = vld [vmem:[%s1931_s1 + $0xb8] sm:$0xff]  ;;  %v535_v25 = vld [vmem:[%s1941_s6 + $0x30] sm:$0xff]  ;;  %v554_v41 = vld [vmem:[%s1931_s1 + $0x40] sm:$0xff] }
  0xd1   : > { %v681_v56 = vadd.f32 %v665_v34, %v630_v44  ;;  %v682_v57 = vadd.f32 %v666_v35, %v631_v45  ;;  %v719_v59 = vmul.f32 %v1115_v43, %v1983_v29  ;;  %v633_v63 = vadd.f32 %v617_v47, %v582_v51  ;;  %v1101_v26 = vld [vmem:[%s1931_s1 + $0x130] sm:$0xff]  ;;  %v536_v33 = vld [vmem:[%s1941_s6 + $0x38] sm:$0xff]  ;;  %v555_v46 = vld [vmem:[%s1931_s1 + $0x48] sm:$0xff] }
  0xd2   : > { %v567_v0 = vmul.f32 %v1966_v15, %v550_v48  ;;  %v568_v1 = vmul.f32 %v1966_v15, %v551_v49  ;;  %v618_v2 = vmul.f32 %v1082_v50, %v1973_v21  ;;  %v683_v8 = vadd.f32 %v667_v52, %v632_v58  ;;  %v1102_v34 = vld [vmem:[%s1931_s1 + $0x138] sm:$0xff]  ;;  %v1118_v35 = vld [vmem:[%s1931_s1 + $0x1b0] sm:$0xff]  ;;  %v1086_v47 = vld [vmem:[%s1931_s1 + $0xc0] sm:$0xff] }
  0xd3   : > { %v732_v6 = vadd.f32 %v716_v39, %v681_v56  ;;  %v733_v7 = vadd.f32 %v717_v40, %v682_v57  ;;  %v619_v9 = vmul.f32 %v1083_v55, %v1973_v21  ;;  %v684_v12 = vadd.f32 %v668_v53, %v633_v63  ;;  %v1119_v40 = vld [vmem:[%s1931_s1 + $0x1b8] sm:$0xff]  ;;  %v537_v52 = vld [vmem:[%s1941_s6 + $0x40] sm:$0xff]  ;;  %v1087_v53 = vld [vmem:[%s1931_s1 + $0xc8] sm:$0xff] }
  0xd4   : > { %v583_v13 = vadd.f32 %v567_v0, %v533_v60  ;;  %v584_v14 = vadd.f32 %v568_v1, %v534_v61  ;;  %v669_v16 = vmul.f32 %v1099_v62, %v1981_v28  ;;  %v734_v22 = vadd.f32 %v718_v54, %v683_v8  ;;  %v1103_v54 = vld [vmem:[%s1931_s1 + $0x140] sm:$0xff]  ;;  %v538_v58 = vld [vmem:[%s1941_s6 + $0x48] sm:$0xff] }
  0xd5   : > { %v1194_v20 = vpack.c.bf16 %v733_v7, %v732_v6  ;;  %v670_v23 = vmul.f32 %v1100_v3, %v1981_v28  ;;  %v720_v24 = vmul.f32 %v1116_v4, %v1983_v29  ;;  %v735_v27 = vadd.f32 %v719_v59, %v684_v12  ;;  %v1104_v60 = vld [vmem:[%s1931_s1 + $0x148] sm:$0xff]  ;;  %v1120_v1 = vld [vmem:[%s1931_s1 + $0x1c0] sm:$0xff]  ;;  %v556_v3 = vld [vmem:[%s1931_s1 + $0x50] sm:$0xff] }
  0xd6   : > { %v634_v30 = vadd.f32 %v618_v2, %v583_v13  ;;  %v635_v31 = vadd.f32 %v619_v9, %v584_v14  ;;  %v721_v32 = vmul.f32 %v1117_v10, %v1983_v29  ;;  %v569_v36 = vmul.f32 %v1966_v15, %v552_v11  ;;  %v1121_v2 = vld [vmem:[%s1931_s1 + $0x1c8] sm:$0xff]  ;;  %v557_v9 = vld [vmem:[%s1931_s1 + $0x58] sm:$0xff]  ;;  %v539_v14 = vld [vmem:[%s1941_s6 + $0x50] sm:$0xff] }
  0xd7   : > { %1195 = vmatpush3.bf16.msra.mxu0 %v1194_v20  ;;  %v570_v37 = vmul.f32 %v1966_v15, %v553_v17  ;;  %v620_v38 = vmul.f32 %v1084_v18, %v1973_v21  ;;  %v621_v39 = vmul.f32 %v1085_v19, %v1973_v21  ;;  %v1197_v42 = vpack.c.bf16 %v735_v27, %v734_v22  ;;  %v1089_v17 = vld [vmem:[%s1931_s1 + $0xd8] sm:$0xff] }
  0xd8   : > { %1196 = vmatprep.subr.bf16.mxu0 %v1615_v5  ;;  %v685_v43 = vadd.f32 %v669_v16, %v634_v30  ;;  %v686_v44 = vadd.f32 %v670_v23, %v635_v31  ;;  %v671_v45 = vmul.f32 %v1101_v26, %v1981_v28  ;;  %v585_v48 = vadd.f32 %v569_v36, %v535_v25  ;;  %v1088_v16 = vld [vmem:[%s1931_s1 + $0xd0] sm:$0xff]  ;;  %v540_v22 = vld [vmem:[%s1941_s6 + $0x58] sm:$0xff] }
  0xd9   : > { %v586_v49 = vadd.f32 %v570_v37, %v536_v33  ;;  %v672_v50 = vmul.f32 %v1102_v34, %v1981_v28  ;;  %v722_v51 = vmul.f32 %v1118_v35, %v1983_v29  ;;  %v723_v57 = vmul.f32 %v1119_v40, %v1983_v29  ;;  %v1106_v31 = vld [vmem:[%s1931_s1 + $0x158] sm:$0xff] }
  0xda   : > { %v736_v55 = vadd.f32 %v720_v24, %v685_v43  ;;  %v737_v56 = vadd.f32 %v721_v32, %v686_v44  ;;  %v571_v59 = vmul.f32 %v1966_v15, %v554_v41  ;;  %v636_v61 = vadd.f32 %v620_v38, %v585_v48  ;;  %v1105_v24 = vld [vmem:[%s1931_s1 + $0x150] sm:$0xff]  ;;  %v1123_v37 = vld [vmem:[%s1931_s1 + $0x1d8] sm:$0xff]  ;;  %v558_v38 = vld [vmem:[%s1931_s1 + $0x60] sm:$0xff] }
  0xdb   : > { %1198 = vmatpush3.bf16.msra.mxu0 %v1197_v42  ;;  %v637_v62 = vadd.f32 %v621_v39, %v586_v49  ;;  %v572_v63 = vmul.f32 %v1966_v15, %v555_v46  ;;  %v622_v0 = vmul.f32 %v1086_v47, %v1973_v21  ;;  %v623_v7 = vmul.f32 %v1087_v53, %v1973_v21  ;;  %v1122_v32 = vld [vmem:[%s1931_s1 + $0x1d0] sm:$0xff]  ;;  %v559_v43 = vld [vmem:[%s1931_s1 + $0x68] sm:$0xff]  ;;  %v1090_v44 = vld [vmem:[%s1931_s1 + $0xe0] sm:$0xff] }
  0xdc   : > { %1199 = vmatprep.subr.bf16.mxu0 %v1615_v5  ;;  %v1200_v4 = vpack.c.bf16 %v737_v56, %v736_v55  ;;  %v587_v6 = vadd.f32 %v571_v59, %v537_v52  ;;  %v673_v8 = vmul.f32 %v1103_v54, %v1981_v28  ;;  %v687_v10 = vadd.f32 %v671_v45, %v636_v61  ;;  %v1091_v45 = vld [vmem:[%s1931_s1 + $0xe8] sm:$0xff] }
  0xdd   : > { %v688_v11 = vadd.f32 %v672_v50, %v637_v62  ;;  %v588_v12 = vadd.f32 %v572_v63, %v538_v58  ;;  %v674_v13 = vmul.f32 %v1104_v60, %v1981_v28  ;;  %v724_v19 = vmul.f32 %v1120_v1, %v1983_v29  ;;  %v541_v50 = vld [vmem:[%s1941_s6 + $0x60] sm:$0xff]  ;;  %v542_v55 = vld [vmem:[%s1941_s6 + $0x68] sm:$0xff] }
  0xde   : > { %v638_v18 = vadd.f32 %v622_v0, %v587_v6  ;;  %v725_v20 = vmul.f32 %v1121_v2, %v1983_v29  ;;  %v573_v23 = vmul.f32 %v1966_v15, %v556_v3  ;;  %v738_v25 = vadd.f32 %v722_v51, %v687_v10  ;;  %v1107_v51 = vld [vmem:[%s1931_s1 + $0x160] sm:$0xff]  ;;  %v1125_v63 = vld [vmem:[%s1931_s1 + $0x1e8] sm:$0xff]  ;;  %v560_v0 = vld [vmem:[%s1931_s1 + $0x70] sm:$0xff] }
  0xdf   : > { %1201 = vmatpush3.bf16.msra.mxu0 %v1200_v4  ;;  %v739_v26 = vadd.f32 %v723_v57, %v688_v11  ;;  %v639_v27 = vadd.f32 %v623_v7, %v588_v12  ;;  %v574_v30 = vmul.f32 %v1966_v15, %v557_v9  ;;  %v624_v35 = vmul.f32 %v1088_v16, %v1973_v21  ;;  %v1108_v57 = vld [vmem:[%s1931_s1 + $0x168] sm:$0xff]  ;;  %v1124_v58 = vld [vmem:[%s1931_s1 + $0x1e0] sm:$0xff]  ;;  %v561_v6 = vld [vmem:[%s1931_s1 + $0x78] sm:$0xff] }
  0xe0   : > { %1202 = vmatprep.subr.bf16.mxu0 %v1615_v5  ;;  %v689_v33 = vadd.f32 %v673_v8, %v638_v18  ;;  %v589_v34 = vadd.f32 %v573_v23, %v539_v14  ;;  %v625_v36 = vmul.f32 %v1089_v17, %v1973_v21  ;;  %v675_v42 = vmul.f32 %v1105_v24, %v1981_v28  ;;  %v1092_v7 = vld [vmem:[%s1931_s1 + $0xf0] sm:$0xff]  ;;  %v1093_v8 = vld [vmem:[%s1931_s1 + $0xf8] sm:$0xff] }
  0xe1   : > { %v1203_v39 = vpack.c.bf16 %v739_v26, %v738_v25  ;;  %v690_v40 = vadd.f32 %v674_v13, %v639_v27  ;;  %v590_v41 = vadd.f32 %v574_v30, %v540_v22  ;;  %v676_v48 = vmul.f32 %v1106_v31, %v1981_v28  ;;  %v543_v13 = vld [vmem:[%s1941_s6 + $0x70] sm:$0xff]  ;;  %v1110_v22 = vld [vmem:[%s1931_s1 + $0x178] sm:$0xff] }
  0xe2   : > { %v740_v46 = vadd.f32 %v724_v19, %v689_v33  ;;  %v640_v47 = vadd.f32 %v624_v35, %v589_v34  ;;  %v726_v49 = vmul.f32 %v1122_v32, %v1983_v29  ;;  %v727_v54 = vmul.f32 %v1123_v37, %v1983_v29  ;;  %v1109_v14 = vld [vmem:[%s1931_s1 + $0x170] sm:$0xff]  ;;  %v544_v19 = vld [vmem:[%s1941_s6 + $0x78] sm:$0xff] }
  0xe3   : > { %1204 = vmatpush3.bf16.msra.mxu0 %v1203_v39  ;;  %v741_v52 = vadd.f32 %v725_v20, %v690_v40  ;;  %v641_v53 = vadd.f32 %v625_v36, %v590_v41  ;;  %v575_v56 = vmul.f32 %v1966_v15, %v558_v38  ;;  %v576_v60 = vmul.f32 %v1966_v15, %v559_v43  ;;  %v1126_v27 = vld [vmem:[%s1931_s1 + $0x1f0] sm:$0xff]  ;;  %v1127_v34 = vld [vmem:[%s1931_s1 + $0x1f8] sm:$0xff]  ;;  %s827_s1 = sld [smem:[#allocation4]] (!%p1128_p7) }
  0xe4   : > { %1205 = vmatprep.subr.bf16.mxu0 %v1615_v5  ;;  %v691_v59 = vadd.f32 %v675_v42, %v640_v47  ;;  %v626_v61 = vmul.f32 %v1090_v44, %v1973_v21  ;;  %v627_v62 = vmul.f32 %v1091_v45, %v1973_v21  ;;  %v677_v4 = vmul.f32 %v1107_v51, %v1981_v28  ;;  %v749_v47 = vld [vmem:[%s445_s29] sm:$0xff] }
  0xe5   : > { %v1206_v1 = vpack.c.bf16 %v741_v52, %v740_v46  ;;  %v692_v2 = vadd.f32 %v676_v48, %v641_v53  ;;  %v591_v3 = vadd.f32 %v575_v56, %v541_v50  ;;  %v592_v10 = vadd.f32 %v576_v60, %v542_v55  ;;  %v748_v48 = vld [vmem:[#allocation2] sm:$0xff]  ;;  %v1132_v55 = vld [vmem:[%s1943_s0 + $0x2] sm:$0x1] (!%p1128_p7)  ;;  %v1134_v60 = vld [vmem:[%s1943_s0 + $0x3] sm:$0x1] (!%p1128_p7) }
  0xe6   : > { %v742_v9 = vadd.f32 %v726_v49, %v691_v59  ;;  %v678_v11 = vmul.f32 %v1108_v57, %v1981_v28  ;;  %v728_v12 = vmul.f32 %v1124_v58, %v1983_v29  ;;  %v729_v18 = vmul.f32 %v1125_v63, %v1983_v29  ;;  %v826_v53 = vld [vmem:[%s523_s26] sm:$0x1] (!%p1128_p7) }
  0xe7   : > { %1207 = vmatpush3.bf16.msra.mxu0 %v1206_v1  ;;  %v743_v16 = vadd.f32 %v727_v54, %v692_v2  ;;  %v642_v17 = vadd.f32 %v626_v61, %v591_v3  ;;  %v577_v20 = vmul.f32 %v1966_v15, %v560_v0  ;;  %v643_v23 = vadd.f32 %v627_v62, %v592_v10 }
  0xe8   : > { %1208 = vmatprep.subr.bf16.mxu0 %v1615_v5  ;;  %v578_v24 = vmul.f32 %v1966_v15, %v561_v6  ;;  %v628_v25 = vmul.f32 %v1092_v7, %v1973_v21  ;;  %v629_v26 = vmul.f32 %v1093_v8, %v1973_v21  ;;  %v679_v33 = vmul.f32 %v1109_v14, %v1981_v28 }
  0xe9   : > { %v1209_v30 = vpack.c.bf16 %v743_v16, %v742_v9  ;;  %v693_v31 = vadd.f32 %v677_v4, %v642_v17  ;;  %v593_v32 = vadd.f32 %v577_v20, %v543_v13  ;;  %v694_v35 = vadd.f32 %v678_v11, %v643_v23 }
  0xea   : > { %v594_v36 = vadd.f32 %v578_v24, %v544_v19  ;;  %v680_v37 = vmul.f32 %v1110_v22, %v1981_v28  ;;  %v730_v15 = vmul.f32 %v1126_v27, %v1983_v29  ;;  %v731_v41 = vmul.f32 %v1127_v34, %v1983_v29  ;;  %v1130_v29 = vld [vmem:[%s1943_s0 + $0x1] sm:$0x1] (!%p1128_p7) }
  0xeb   : > { %1210 = vmatpush3.bf16.msra.mxu0 %v1209_v30  ;;  %v744_v38 = vadd.f32 %v728_v12, %v693_v31  ;;  %v644_v39 = vadd.f32 %v628_v25, %v593_v32  ;;  %v745_v21 = vadd.f32 %v729_v18, %v694_v35  ;;  %v853_v52 = vlaneseq (!%p1128_p7) }
  0xec   : > { %1211 = vmatprep.subr.bf16.mxu0 %v1615_v5  ;;  %v645_v40 = vadd.f32 %v629_v26, %v594_v36  ;;  %v829_v54 = vstv (!%p1128_p7), %s827_s1  ;;  %v835_v57 = vstv (!%p1128_p7), %s1129_s10  ;;  %v841_v58 = vstv (!%p1128_p7), %s1131_s12 }
  0xed   : > { %v695_v42 = vadd.f32 %v679_v33, %v644_v39  ;;  %v1212_v43 = vpack.c.bf16 %v745_v21, %v744_v38  ;;  %v836_v59 = vmul.f32 (!%p1128_p7), %v1130_v29, %v835_v57  ;;  %v847_v61 = vstv (!%p1128_p7), %s1133_s24 }
  0xee   : > { %v696_v44 = vadd.f32 %v680_v37, %v645_v40  ;;  %v842_v63 = vmul.f32 (!%p1128_p7), %v1132_v55, %v841_v58  ;;  %v854_v0 = vshrl.u32 (!%p1128_p7), %v853_v52, 7  ;;  %v848_v2 = vmul.f32 (!%p1128_p7), %v1134_v60, %v847_v61 }
  0xef   : > { %v746_v45 = vadd.f32 %v730_v15, %v695_v42  ;;  %1213 = vmatpush3.bf16.msra.mxu0 %v1212_v43  ;;  %v859_v9 = vstv (!%p1128_p7), %s850_s22 }
  0xf0   : > { %v747_v46 = vadd.f32 %v731_v41, %v696_v44  ;;  %1214 = vmatprep.subr.bf16.mxu0 %v1615_v5  ;;  %v828_v5 = vld [vmem:[%s1943_s0] sm:$0x1] (!%p1128_p7)  ;;  %v855_v4 = vsub.s32 (!%p1128_p7), 0, %v854_v0 }
  0xf1   : > { %v830_v56 = vmul.f32 (!%p1128_p7), %v829_v54, %v828_v5 }
  0xf2   : > { %v1215_v28 = vpack.c.bf16 %v747_v46, %v746_v45 }
  0xf3   : > { %v831_v62 = vadd.f32 (!%p1128_p7), %v830_v56, %v826_v53 }
  0xf4   : > { %1216 = vmatpush3.bf16.msra.mxu0 %v1215_v28 }
  0xf5   : > { %v837_v1 = vadd.f32 (!%p1128_p7), %v836_v59, %v831_v62 }
  0xf7   : > { %1191 = vmatmul.mubr.f32.vlgmr.msra.gmra.mrb[0].mxu0 %v749_v47  ;;  %v843_v3 = vadd.f32 (!%p1128_p7), %v842_v63, %v837_v1 }
  0xf9   : > { %v849_v6 = vadd.f32 (!%p1128_p7), %v848_v2, %v843_v3 }
  0xfb   : > { %v856_v8 = vrot.slane (!%p1128_p7), %v849_v6, %v855_v4 }
 0x1c7   : > { %825 = sbr.rel (%p1128_p7) target bundleno = 474 (0x1da), region = 106 }
 0x1ca   : > { %v816_v49 = vpop.f32.mrb[0].mxu0 }
 0x1cb   : > { %v820_v50 = vadd.f32 %v816_v49, %v748_v48  ;;  %v1192_v51 = vpop.f32.mrb[1].mxu0 }
 0x1cd   : > { %821 = vst [vmem:[#allocation2] sm:$0xff] %v820_v50 }
 0x1d4   : > { %v851_v7 = vld [vmem:[#allocation2] sm:$0xff] }
 0x1d5   : > { %v858_v10 = vadd.f32 %v856_v8, %v851_v7 }
 0x1d7   : > { %v860_v11 = vmul.f32 %v859_v9, %v858_v10 }
 0x1d9   : > { %861 = vst [vmem:[%s1954_s11] sm:$0xff] %v860_v11 }
 0x1da PF: > { %s2276_s16 = sld [smem:[#allocation25_spill]]  ;;  %s2277_s0 = sld [smem:[#allocation31_spill]] }
 0x1db   : > { %s2278_s26 = sld [smem:[#allocation37_spill]]  ;;  %s878_s21 = sshll.u32 %s1954_s11, 4  ;;  %s879_s21 = int_to_ptr.vmem [resolvable:$true] %s878_s21 }
 0x1dc   : > { %s863_s27 = scalar_lea.sflag [#allocation6], %s1938_s17  ;;  %s1445_s19 = scalar_lea.vmem %s879_s21, 128 }
 0x1dd   : > { %p1446_p8 = scmp.ne.s32.totalorder %s879_s21, %s1445_s19  ;;  %s1618_s20 = smov [#allocation13]  }
 0x1de   : > { %s1449_s1 = sshll.u32 %s1618_s20, 4  ;;  %s1450_s1 = int_to_ptr.vmem [resolvable:$false] %s1449_s1 }
 0x1df   : > { %s1451_s10 = scalar_lea.vmem %s1450_s1, 256  ;;  %p1452_p2 = scmp.lt.s32.totalorder %s879_s21, %s1450_s1 }
 0x1e0   : > { %s1136_s23 = sshll.u32 %s2276_s16, 7  ;;  %p2280_p4 = scmp.ne.s32.totalorder %s2277_s0, 0 }
 0x1e1   : > { %s2279_s2 = smov %s2278_s26  ;;  %s2134_s18 = scalar_lea.hbm %s2278_s26, %s1136_s23 }
 0x1e2   : > { %p1447_p0 = pnand %p1446_p8, %p2280_p4  ;;  %p1453_p10 = scmp.lt.s32.totalorder %s1451_s10, %s1445_s19 }
 0x1e4   : > { %p1448_p13 = pneg %p1447_p0  ;;  %p1454_p3 = por %p1453_p10, %p1452_p2 }
 0x1e6   : > { %p1455_p1 = pnand %p1454_p3, %p1448_p13 }
 0x1e8   : > { %1458 = shalt.err (!%p1455_p1)
}
 0x1e9   : > { %s1459_s17 = scalar_lea.hbm %s2134_s18, 128  ;;  %s1463_s24 = scalar_lea.hbm %s2279_s2, 256 }
 0x1ea   : > { %p1460_p5 = scmp.ne.s32.totalorder %s2134_s18, %s1459_s17  ;;  %p1464_p11 = scmp.lt.u32.totalorder %s2134_s18, %s2279_s2 }
 0x1eb   : > { %p1465_p12 = scmp.lt.u32.totalorder %s1463_s24, %s1459_s17  ;;  %p1467_p8 = scmp.lt.u32.totalorder %s1459_s17, %s2134_s18 }
 0x1ec   : > { %p1461_p6 = pnand %p1460_p5, %p2280_p4 }
 0x1ed   : > { %p1466_p7 = por %p1465_p12, %p1464_p11 }
 0x1ee   : > { %p1462_p9 = pneg %p1461_p6 }
 0x1ef   : > { %p1468_p0 = por %p1467_p8, %p1466_p7 }
 0x1f1   : > { %p1469_p13 = pnand %p1468_p0, %p1462_p9 }
 0x1f3   : > { %1472 = shalt.err (!%p1469_p13)
}
 0x1f4   : > { %1234 = dma.vmem_to_hbm [thread:$0]  (%p2280_p4), %s879_s21, 128, %s2134_s18, %s863_s27  }
 0x1f5 PF: > { %s2281_s6 = sld [smem:[#allocation21_spill]]  ;;  %s2282_s22 = sld [smem:[#allocation32_spill]] }
 0x1f6   : > { %p1246_p2 = scmp.ge.s32.totalorder %s1599_s15, 2 }
 0x1fb   : > { %s890_s16 = sand.u32 1, %s2281_s6   ;;  %p2283_p10 = scmp.ne.s32.totalorder %s2282_s22, 0 }
 0x1fc   : > { %s891_s23 = scalar_lea.sflag [#allocation6], %s890_s16 }
 0x1fd   : > { %p1241_p3 = pnand %p1246_p2, %p2283_p10 }
 0x1ff   : > { %1542 = dma.done.wait (!%p1241_p3), %s891_s23, 128  }
 0x200   : > { %1544 = vsyncadd (!%p1241_p3), %s891_s23, 4294967168  ;;  %s28_s15 = sadd.s32 1, %s1599_s15   ;;  %s2285_s26 = sld [smem:[#allocation22_spill]] }
 0x201   : > { %p2160_p1 = scmp.ge.s32.totalorder %s28_s15, 6   ;;  %s2286_s0 = sld [smem:[#allocation30_spill]] }
 0x202   : > { %s2287_s25 = sld [smem:[#allocation29_spill]]  ;;  %s2288_s18 = sld [smem:[#allocation23_spill]] }
 0x203   : > { %s2289_s10 = sld [smem:[#allocation28_spill]]  ;;  %s2290_s21 = sld [smem:[#allocation26_spill]] }
 0x204   : > { %s2291_s19 = sld [smem:[#allocation27_spill]]  ;;  %s2292_s27 = smov %s1555_s28 }
 0x205   : > { %s2294_s29 = smov %s1563_s30  ;;  %s2295_s30 = smov %s1567_s8 }
 0x206   : > { %s2297_s1 = smov %s1575_s9  ;;  %s2299_s11 = smov %s1591_s13 }
 0x207   : > { %s2293_s28 = smov %s2286_s0  ;;  %s2300_s12 = smov %s1595_s14 }
 0x208   : > { %s2296_s8 = smov %s2287_s25  ;;  %s2298_s9 = smov %s2288_s18 }
 0x209   : > { %s2301_s13 = smov %s2290_s21  ;;  %27 = sbr.rel (!%p2160_p1) target bundleno = 20 (0x14), region = 186 }
 0x20a   : > { %s2302_s14 = smov %s2291_s19 }
 0x210   :  { %896 = vsyncpa [#allocation5], 1 }
 0x211   :  { %898 = vsyncpa [#allocation5 + $0x1], 1 }
 0x212   :  { %899 = vsyncpa [#allocation10], 1 }
 0x213   :  { %901 = vsyncpa [#allocation10 + $0x1], 1 }
 0x214   :  { %902 = vsyncpa [#allocation6], 1 }
 0x215   :  { %904 = vsyncpa [#allocation6 + $0x1], 1 }
 0x216   :  { %905 = vsyncpa [#allocation7], 1 }
 0x217   :  { %907 = vsyncpa [#allocation7 + $0x1], 1 }

</bundles_post_ra>
